<compile_context>
chip_gen: v5e
topology: v5e:2x2
jax: 0.10.0
libtpu: 0.0.40
codegen_flags: <defaults>
</compile_context>

<pallas_src>
import jax
import jax.numpy as jnp
from jax.experimental import pallas as pl
from jax.experimental.pallas import tpu as pltpu


def _rnn_double_stacked_kernel(x_ref,       # (Lmax, BP, 1) f32  rows p-major: r = p*Bblk + b
                               len_ref,     # (BP, 1)   i32  per-particle true lengths
                               np_ref,      # (Bblk, 1) i32  per-event true particle counts
                               wih1_ref,    # (1, H)    f32  W_ih1 (input_size == 1)
                               b1_ref,      # (1, H)    f32  b_ih1 + b_hh1
                               whh1t_ref,   # (H, H)    bf16 W_hh1^T
                               wih2t_ref,   # (H, H)    bf16 W_ih2^T
                               whh2t_ref,   # (H, H)    bf16 W_hh2^T
                               b2_ref,      # (1, H)    f32  b_ih2 + b_hh2
                               out_ref,     # (Bblk, H) f32  net2 final hidden per event
                               u1_scr,      # VMEM (Lmax, BP, H) f32
                               u2_scr):     # VMEM (BP, H) f32
    Lmax, BP, _ = x_ref.shape
    Bblk, H = out_ref.shape
    Pp = BP // Bblk

    # --- hoisted net1 input projection: one vectorized pass, off the serial chain ---
    u1_scr[...] = x_ref[...] * wih1_ref[...] + b1_ref[...]          # (Lmax, BP, H)

    whh1t = whh1t_ref[...]                                          # (H, H) bf16
    mxu = whh1t.dtype
    # hoisted lane-dense freeze-mask operand (no per-iteration broadcast_in_dim)
    lenb = jnp.broadcast_to(len_ref[...], (BP, H))                  # (BP, H) i32

    # --- net1: ONE recurrent chain over all particles of all events in the block ---
    def step1(t, h):                                                # h: (BP, H) f32
        u = u1_scr[t]                                               # contiguous (BP, H)
        hv = jnp.dot(h.astype(mxu), whh1t, preferred_element_type=jnp.float32)
        new_h = jnp.tanh(u + hv)
        return jnp.where(t < lenb, new_h, h)                        # freeze ended particles

    h1 = jax.lax.fori_loop(0, Lmax, step1,
                           jnp.zeros((BP, H), jnp.float32), unroll=True)

    # --- net2 input projection hoisted off the serial chain: one batched matmul ---
    u2_scr[...] = jnp.dot(h1.astype(mxu), wih2t_ref[...],
                          preferred_element_type=jnp.float32) + b2_ref[...]

    whh2t = whh2t_ref[...]                                          # (H, H) bf16
    nb = jnp.broadcast_to(np_ref[...], (Bblk, H))                   # (Bblk, H) i32

    # --- net2: ONE recurrent chain over particle slots, Bblk events wide ---
    def step2(t, h2):                                               # h2: (Bblk, H) f32
        start = pl.multiple_of(t * Bblk, Bblk)
        u2t = u2_scr[pl.ds(start, Bblk), :]                         # contiguous (Bblk, H)
        hv = jnp.dot(h2.astype(mxu), whh2t, preferred_element_type=jnp.float32)
        new_h2 = jnp.tanh(u2t + hv)
        return jnp.where(t < nb, new_h2, h2)                        # freeze finished events

    out_ref[...] = jax.lax.fori_loop(0, Pp, step2,
                                     jnp.zeros((Bblk, H), jnp.float32), unroll=True)


def _next_pow2(n):
    p = 1
    while p < n:
        p *= 2
    return p


def _round_up(n, m):
    return ((n + m - 1) // m) * m


def rnn_double_stacked(x_padded, lengths, n_particles, params, *, mxu_dtype=jnp.bfloat16):
    """Batched forward of RNNDoubleStacked (mode='vanilla_rnn', tanh).

    x_padded:    f32[B, Lmax, Pmax, 1]  zero-padded per-particle scalar sequences
    lengths:     i32[B, Pmax]           true sequence length of each particle
    n_particles: i32[B]                 true number of particles per event
    returns      f32[B, 1, H]           net2 final hidden state per event
    """
    B, Lmax, Pmax, in_size = x_padded.shape
    assert in_size == 1
    H = params["w_hh1"].shape[0]

    # ---- event-block sizing: batch events per grid step, cap live state ~128 rows ----
    Pp = _next_pow2(max(1, Pmax))            # pad particle slots for clean tiling
    if Pp <= 128:
        Bblk = max(8, 128 // Pp)
    else:
        Pp = _round_up(Pmax, 8)
        Bblk = 8
    if B <= Bblk:                            # don't over-pad tiny batches
        Bblk = max(8, _round_up(B, 8))
    nblk = pl.cdiv(B, Bblk)
    Bpad = nblk * Bblk
    BP = Bblk * Pp                           # recurrent rows per block (particle-major)

    # ---- pad + rearrange inputs so rows are r = p*Bblk + b_local within each block ----
    x = jnp.zeros((Bpad, Lmax, Pp), jnp.float32).at[:B, :, :Pmax].set(
        x_padded[..., 0].astype(jnp.float32))
    lens = jnp.zeros((Bpad, Pp), jnp.int32).at[:B, :Pmax].set(lengths.astype(jnp.int32))
    nprt = jnp.zeros((Bpad,), jnp.int32).at[:B].set(n_particles.astype(jnp.int32))

    x_arr = (x.reshape(nblk, Bblk, Lmax, Pp)
              .transpose(2, 0, 3, 1)
              .reshape(Lmax, nblk * BP, 1))
    len_arr = (lens.reshape(nblk, Bblk, Pp)
                   .transpose(0, 2, 1)
                   .reshape(nblk * BP, 1))
    np_arr = nprt.reshape(Bpad, 1)

    # ---- parameter prep: fold bias pairs, pre-transpose; bf16 ONLY for MXU operands ----
    wih1 = params["w_ih1"].reshape(1, H).astype(jnp.float32)
    b1 = (params["b_ih1"] + params["b_hh1"]).reshape(1, H).astype(jnp.float32)
    b2 = (params["b_ih2"] + params["b_hh2"]).reshape(1, H).astype(jnp.float32)
    whh1t = params["w_hh1"].T.astype(mxu_dtype)
    wih2t = params["w_ih2"].T.astype(mxu_dtype)
    whh2t = params["w_hh2"].T.astype(mxu_dtype)

    grid_spec = pltpu.PrefetchScalarGridSpec(
        num_scalar_prefetch=0,
        grid=(nblk,),
        in_specs=[
            pl.BlockSpec((Lmax, BP, 1), lambda i: (0, i, 0)),   # x (time, rows, 1)
            pl.BlockSpec((BP, 1), lambda i: (i, 0)),            # per-particle lengths
            pl.BlockSpec((Bblk, 1), lambda i: (i, 0)),          # per-event particle counts
            pl.BlockSpec((1, H), lambda i: (0, 0)),             # W_ih1
            pl.BlockSpec((1, H), lambda i: (0, 0)),             # b1
            pl.BlockSpec((H, H), lambda i: (0, 0)),             # W_hh1^T (bf16)
            pl.BlockSpec((H, H), lambda i: (0, 0)),             # W_ih2^T (bf16)
            pl.BlockSpec((H, H), lambda i: (0, 0)),             # W_hh2^T (bf16)
            pl.BlockSpec((1, H), lambda i: (0, 0)),             # b2
        ],
        out_specs=pl.BlockSpec((Bblk, H), lambda i: (i, 0)),    # sublane-dense output tile
        scratch_shapes=[
            pltpu.VMEM((Lmax, BP, H), jnp.float32),             # hoisted net1 input proj
            pltpu.VMEM((BP, H), jnp.float32),                   # hoisted net2 input proj
        ],
    )

    out = pl.pallas_call(
        _rnn_double_stacked_kernel,
        out_shape=jax.ShapeDtypeStruct((Bpad, H), jnp.float32),
        grid_spec=grid_spec,
        compiler_params=pltpu.CompilerParams(
            dimension_semantics=("parallel",)),                 # event blocks across TCs
    )(x_arr, len_arr, np_arr, wih1, b1, whh1t, wih2t, whh2t, b2)

    return out[:B].reshape(B, 1, H)


def reference(event, params):
    """Pure-JAX mirror of the PyTorch forward (mode='vanilla_rnn', tanh), one event."""
    H = params["w_hh1"].shape[0]

    def run_rnn(seq, w_ih, w_hh, b_ih, b_hh):
        h = jnp.zeros((H,), jnp.float32)
        for t in range(seq.shape[0]):
            h = jnp.tanh(seq[t] @ w_ih.T + b_ih + h @ w_hh.T + b_hh)
        return h

    hidden_list = [run_rnn(p, params["w_ih1"], params["w_hh1"],
                           params["b_ih1"], params["b_hh1"]) for p in event]
    hid = jnp.stack(hidden_list, axis=0)          # torch.cat(dim=0) of (1,H) hiddens
    h2 = run_rnn(hid, params["w_ih2"], params["w_hh2"],
                 params["b_ih2"], params["b_hh2"])
    return h2.reshape(1, H)


if __name__ == "__main__":
    key = jax.random.PRNGKey(0)
    H = 32
    # double-jagged batch: events with varying #particles, each with varying #features
    events_lengths = [[6, 3, 8, 5], [2, 7, 4]]
    B = len(events_lengths)
    Pmax = max(len(ls) for ls in events_lengths)
    Lmax = max(max(ls) for ls in events_lengths)

    n_total = sum(len(ls) for ls in events_lengths)
    keys = jax.random.split(key, n_total + 8)

    events = []
    ki = 0
    for ls in events_lengths:
        ev = []
        for L in ls:
            ev.append(jax.random.normal(keys[ki], (L, 1), jnp.float32))
            ki += 1
        events.append(ev)

    k = 1.0 / jnp.sqrt(jnp.float32(H))   # PyTorch RNN default uniform(-1/sqrt(H), 1/sqrt(H))

    def unif(kk, shape):
        return jax.random.uniform(kk, shape, jnp.float32, minval=-k, maxval=k)

    params = {
        "w_ih1": unif(keys[ki + 0], (H, 1)),
        "w_hh1": unif(keys[ki + 1], (H, H)),
        "b_ih1": unif(keys[ki + 2], (H,)),
        "b_hh1": unif(keys[ki + 3], (H,)),
        "w_ih2": unif(keys[ki + 4], (H, H)),
        "w_hh2": unif(keys[ki + 5], (H, H)),
        "b_ih2": unif(keys[ki + 6], (H,)),
        "b_hh2": unif(keys[ki + 7], (H,)),
    }

    # pad the double-jagged batch into the kernel layout
    x_padded = jnp.zeros((B, Lmax, Pmax, 1), jnp.float32)
    lengths = jnp.zeros((B, Pmax), jnp.int32)
    n_particles = jnp.array([len(ls) for ls in events_lengths], jnp.int32)
    for b, ev in enumerate(events):
        for p, seq in enumerate(ev):
            L = seq.shape[0]
            x_padded = x_padded.at[b, :L, p, :].set(seq)
            lengths = lengths.at[b, p].set(L)

    out = rnn_double_stacked(x_padded, lengths, n_particles, params)
    out = jax.block_until_ready(out)

    ref = jnp.stack([reference(ev, params) for ev in events], axis=0)
    assert out.shape == (B, 1, H), out.shape
    # tolerance relaxed vs f32 reference because the (H,H) weights feed the MXU in bf16
    assert jnp.allclose(out, ref, atol=3e-2, rtol=0.0), (out, ref)
    print("KERNEL_OK")
</pallas_src>

<mosaic_0001>
module attributes {stable_mosaic.version = 11 : i64} {
  func.func @_rnn_double_stacked_kernel(%arg0: i32, %arg1: memref<8x32x1xf32, #tpu.memory_space<vmem>>, %arg2: memref<32x1xi32, #tpu.memory_space<vmem>>, %arg3: memref<8x1xi32, #tpu.memory_space<vmem>>, %arg4: memref<1x32xf32, #tpu.memory_space<vmem>>, %arg5: memref<1x32xf32, #tpu.memory_space<vmem>>, %arg6: memref<32x32xbf16, #tpu.memory_space<vmem>>, %arg7: memref<32x32xbf16, #tpu.memory_space<vmem>>, %arg8: memref<32x32xbf16, #tpu.memory_space<vmem>>, %arg9: memref<1x32xf32, #tpu.memory_space<vmem>>, %arg10: memref<8x32xf32, #tpu.memory_space<vmem>>, %arg11: memref<8x32x32xf32, #tpu.memory_space<vmem>>, %arg12: memref<32x32xf32, #tpu.memory_space<vmem>>) attributes {dimension_semantics = [#tpu.dimension_semantics<parallel>], iteration_bounds = array<i64: 1>, scalar_prefetch = 0 : i64, scratch_operands = 2 : i64, tpu.core_type = #tpu.core_type<tc>, window_params = [{transform_indices = @transform_0, window_bounds = array<i64: 8, 32, 1>}, {transform_indices = @transform_1, window_bounds = array<i64: 32, 1>}, {transform_indices = @transform_2, window_bounds = array<i64: 8, 1>}, {pipeline_mode = #tpu.pipeline_mode<synchronous>, transform_indices = @transform_3, window_bounds = array<i64: 1, 32>}, {pipeline_mode = #tpu.pipeline_mode<synchronous>, transform_indices = @transform_4, window_bounds = array<i64: 1, 32>}, {pipeline_mode = #tpu.pipeline_mode<synchronous>, transform_indices = @transform_5, window_bounds = array<i64: 32, 32>}, {pipeline_mode = #tpu.pipeline_mode<synchronous>, transform_indices = @transform_6, window_bounds = array<i64: 32, 32>}, {pipeline_mode = #tpu.pipeline_mode<synchronous>, transform_indices = @transform_7, window_bounds = array<i64: 32, 32>}, {pipeline_mode = #tpu.pipeline_mode<synchronous>, transform_indices = @transform_8, window_bounds = array<i64: 1, 32>}, {transform_indices = @transform_9, window_bounds = array<i64: 8, 32>}]} {
    %c0 = arith.constant 0 : index
    %c0_0 = arith.constant 0 : index
    %c0_1 = arith.constant 0 : index
    %0 = vector.load %arg1[%c0, %c0_0, %c0_1] : memref<8x32x1xf32, #tpu.memory_space<vmem>>, vector<8x32x1xf32>
    %c0_2 = arith.constant 0 : index
    %c0_3 = arith.constant 0 : index
    %1 = vector.load %arg4[%c0_2, %c0_3] : memref<1x32xf32, #tpu.memory_space<vmem>>, vector<1x32xf32>
    %2 = vector.shape_cast %1 : vector<1x32xf32> to vector<1x1x32xf32>
    %3 = vector.broadcast %0 : vector<8x32x1xf32> to vector<8x32x32xf32>
    %4 = vector.broadcast %2 : vector<1x1x32xf32> to vector<8x32x32xf32>
    %5 = arith.mulf %3, %4 : vector<8x32x32xf32>
    %c0_4 = arith.constant 0 : index
    %c0_5 = arith.constant 0 : index
    %6 = vector.load %arg5[%c0_4, %c0_5] : memref<1x32xf32, #tpu.memory_space<vmem>>, vector<1x32xf32>
    %7 = vector.shape_cast %6 : vector<1x32xf32> to vector<1x1x32xf32>
    %8 = vector.broadcast %7 : vector<1x1x32xf32> to vector<8x32x32xf32>
    %9 = arith.addf %5, %8 : vector<8x32x32xf32>
    %c0_6 = arith.constant 0 : index
    %c0_7 = arith.constant 0 : index
    %c0_8 = arith.constant 0 : index
    %10 = vector.load %arg11[%c0_6, %c0_7, %c0_8] : memref<8x32x32xf32, #tpu.memory_space<vmem>>, vector<8x32x32xf32>
    tpu.vector_store %arg11[%c0_6, %c0_7, %c0_8], %9 {strides = array<i32>} : memref<8x32x32xf32, #tpu.memory_space<vmem>>, vector<8x32x32xf32>,
    %c0_9 = arith.constant 0 : index
    %c0_10 = arith.constant 0 : index
    %11 = vector.load %arg6[%c0_9, %c0_10] : memref<32x32xbf16, #tpu.memory_space<vmem>>, vector<32x32xbf16>
    %c0_11 = arith.constant 0 : index
    %c0_12 = arith.constant 0 : index
    %12 = vector.load %arg2[%c0_11, %c0_12] : memref<32x1xi32, #tpu.memory_space<vmem>>, vector<32x1xi32>
    %13 = vector.shape_cast %12 : vector<32x1xi32> to vector<32x1xi32>
    %14 = vector.broadcast %13 : vector<32x1xi32> to vector<32x32xi32>
    %cst = arith.constant 0.000000e+00 : f32
    %15 = vector.broadcast %cst : f32 to vector<32x32xf32>
    %c0_i32 = arith.constant 0 : i32
    %16 = arith.index_cast %c0_i32 : i32 to index
    %c0_13 = arith.constant 0 : index
    %c0_14 = arith.constant 0 : index
    %17 = vector.load %arg11[%16, %c0_13, %c0_14] : memref<8x32x32xf32, #tpu.memory_space<vmem>>, vector<1x32x32xf32>
    %18 = vector.shape_cast %17 : vector<1x32x32xf32> to vector<32x32xf32>
    %19 = arith.truncf %15 : vector<32x32xf32> to vector<32x32xbf16>
    %cst_15 = arith.constant dense<0.000000e+00> : vector<32x32xf32>
    %20 = tpu.matmul %19, %11, %cst_15 {dimension_numbers = #tpu.dot_dimension_numbers<[1], [0], [0], [1], [0, 0, 1, 1], [], []>} : vector<32x32xbf16>, vector<32x32xbf16>, vector<32x32xf32> -> vector<32x32xf32>
    %21 = arith.addf %18, %20 : vector<32x32xf32>
    %22 = math.tanh %21 : vector<32x32xf32>
    %23 = vector.broadcast %c0_i32 : i32 to vector<32x32xi32>
    %24 = arith.cmpi slt, %23, %14 : vector<32x32xi32>
    %25 = arith.select %24, %22, %15 : vector<32x32xi1>, vector<32x32xf32>
    %c1_i32 = arith.constant 1 : i32
    %26 = arith.index_cast %c1_i32 : i32 to index
    %c0_16 = arith.constant 0 : index
    %c0_17 = arith.constant 0 : index
    %27 = vector.load %arg11[%26, %c0_16, %c0_17] : memref<8x32x32xf32, #tpu.memory_space<vmem>>, vector<1x32x32xf32>
    %28 = vector.shape_cast %27 : vector<1x32x32xf32> to vector<32x32xf32>
    %29 = arith.truncf %25 : vector<32x32xf32> to vector<32x32xbf16>
    %cst_18 = arith.constant dense<0.000000e+00> : vector<32x32xf32>
    %30 = tpu.matmul %29, %11, %cst_18 {dimension_numbers = #tpu.dot_dimension_numbers<[1], [0], [0], [1], [0, 0, 1, 1], [], []>} : vector<32x32xbf16>, vector<32x32xbf16>, vector<32x32xf32> -> vector<32x32xf32>
    %31 = arith.addf %28, %30 : vector<32x32xf32>
    %32 = math.tanh %31 : vector<32x32xf32>
    %33 = vector.broadcast %c1_i32 : i32 to vector<32x32xi32>
    %34 = arith.cmpi slt, %33, %14 : vector<32x32xi32>
    %35 = arith.select %34, %32, %25 : vector<32x32xi1>, vector<32x32xf32>
    %c2_i32 = arith.constant 2 : i32
    %36 = arith.index_cast %c2_i32 : i32 to index
    %c0_19 = arith.constant 0 : index
    %c0_20 = arith.constant 0 : index
    %37 = vector.load %arg11[%36, %c0_19, %c0_20] : memref<8x32x32xf32, #tpu.memory_space<vmem>>, vector<1x32x32xf32>
    %38 = vector.shape_cast %37 : vector<1x32x32xf32> to vector<32x32xf32>
    %39 = arith.truncf %35 : vector<32x32xf32> to vector<32x32xbf16>
    %cst_21 = arith.constant dense<0.000000e+00> : vector<32x32xf32>
    %40 = tpu.matmul %39, %11, %cst_21 {dimension_numbers = #tpu.dot_dimension_numbers<[1], [0], [0], [1], [0, 0, 1, 1], [], []>} : vector<32x32xbf16>, vector<32x32xbf16>, vector<32x32xf32> -> vector<32x32xf32>
    %41 = arith.addf %38, %40 : vector<32x32xf32>
    %42 = math.tanh %41 : vector<32x32xf32>
    %43 = vector.broadcast %c2_i32 : i32 to vector<32x32xi32>
    %44 = arith.cmpi slt, %43, %14 : vector<32x32xi32>
    %45 = arith.select %44, %42, %35 : vector<32x32xi1>, vector<32x32xf32>
    %c3_i32 = arith.constant 3 : i32
    %46 = arith.index_cast %c3_i32 : i32 to index
    %c0_22 = arith.constant 0 : index
    %c0_23 = arith.constant 0 : index
    %47 = vector.load %arg11[%46, %c0_22, %c0_23] : memref<8x32x32xf32, #tpu.memory_space<vmem>>, vector<1x32x32xf32>
    %48 = vector.shape_cast %47 : vector<1x32x32xf32> to vector<32x32xf32>
    %49 = arith.truncf %45 : vector<32x32xf32> to vector<32x32xbf16>
    %cst_24 = arith.constant dense<0.000000e+00> : vector<32x32xf32>
    %50 = tpu.matmul %49, %11, %cst_24 {dimension_numbers = #tpu.dot_dimension_numbers<[1], [0], [0], [1], [0, 0, 1, 1], [], []>} : vector<32x32xbf16>, vector<32x32xbf16>, vector<32x32xf32> -> vector<32x32xf32>
    %51 = arith.addf %48, %50 : vector<32x32xf32>
    %52 = math.tanh %51 : vector<32x32xf32>
    %53 = vector.broadcast %c3_i32 : i32 to vector<32x32xi32>
    %54 = arith.cmpi slt, %53, %14 : vector<32x32xi32>
    %55 = arith.select %54, %52, %45 : vector<32x32xi1>, vector<32x32xf32>
    %c4_i32 = arith.constant 4 : i32
    %56 = arith.index_cast %c4_i32 : i32 to index
    %c0_25 = arith.constant 0 : index
    %c0_26 = arith.constant 0 : index
    %57 = vector.load %arg11[%56, %c0_25, %c0_26] : memref<8x32x32xf32, #tpu.memory_space<vmem>>, vector<1x32x32xf32>
    %58 = vector.shape_cast %57 : vector<1x32x32xf32> to vector<32x32xf32>
    %59 = arith.truncf %55 : vector<32x32xf32> to vector<32x32xbf16>
    %cst_27 = arith.constant dense<0.000000e+00> : vector<32x32xf32>
    %60 = tpu.matmul %59, %11, %cst_27 {dimension_numbers = #tpu.dot_dimension_numbers<[1], [0], [0], [1], [0, 0, 1, 1], [], []>} : vector<32x32xbf16>, vector<32x32xbf16>, vector<32x32xf32> -> vector<32x32xf32>
    %61 = arith.addf %58, %60 : vector<32x32xf32>
    %62 = math.tanh %61 : vector<32x32xf32>
    %63 = vector.broadcast %c4_i32 : i32 to vector<32x32xi32>
    %64 = arith.cmpi slt, %63, %14 : vector<32x32xi32>
    %65 = arith.select %64, %62, %55 : vector<32x32xi1>, vector<32x32xf32>
    %c5_i32 = arith.constant 5 : i32
    %66 = arith.index_cast %c5_i32 : i32 to index
    %c0_28 = arith.constant 0 : index
    %c0_29 = arith.constant 0 : index
    %67 = vector.load %arg11[%66, %c0_28, %c0_29] : memref<8x32x32xf32, #tpu.memory_space<vmem>>, vector<1x32x32xf32>
    %68 = vector.shape_cast %67 : vector<1x32x32xf32> to vector<32x32xf32>
    %69 = arith.truncf %65 : vector<32x32xf32> to vector<32x32xbf16>
    %cst_30 = arith.constant dense<0.000000e+00> : vector<32x32xf32>
    %70 = tpu.matmul %69, %11, %cst_30 {dimension_numbers = #tpu.dot_dimension_numbers<[1], [0], [0], [1], [0, 0, 1, 1], [], []>} : vector<32x32xbf16>, vector<32x32xbf16>, vector<32x32xf32> -> vector<32x32xf32>
    %71 = arith.addf %68, %70 : vector<32x32xf32>
    %72 = math.tanh %71 : vector<32x32xf32>
    %73 = vector.broadcast %c5_i32 : i32 to vector<32x32xi32>
    %74 = arith.cmpi slt, %73, %14 : vector<32x32xi32>
    %75 = arith.select %74, %72, %65 : vector<32x32xi1>, vector<32x32xf32>
    %c6_i32 = arith.constant 6 : i32
    %76 = arith.index_cast %c6_i32 : i32 to index
    %c0_31 = arith.constant 0 : index
    %c0_32 = arith.constant 0 : index
    %77 = vector.load %arg11[%76, %c0_31, %c0_32] : memref<8x32x32xf32, #tpu.memory_space<vmem>>, vector<1x32x32xf32>
    %78 = vector.shape_cast %77 : vector<1x32x32xf32> to vector<32x32xf32>
    %79 = arith.truncf %75 : vector<32x32xf32> to vector<32x32xbf16>
    %cst_33 = arith.constant dense<0.000000e+00> : vector<32x32xf32>
    %80 = tpu.matmul %79, %11, %cst_33 {dimension_numbers = #tpu.dot_dimension_numbers<[1], [0], [0], [1], [0, 0, 1, 1], [], []>} : vector<32x32xbf16>, vector<32x32xbf16>, vector<32x32xf32> -> vector<32x32xf32>
    %81 = arith.addf %78, %80 : vector<32x32xf32>
    %82 = math.tanh %81 : vector<32x32xf32>
    %83 = vector.broadcast %c6_i32 : i32 to vector<32x32xi32>
    %84 = arith.cmpi slt, %83, %14 : vector<32x32xi32>
    %85 = arith.select %84, %82, %75 : vector<32x32xi1>, vector<32x32xf32>
    %c7_i32 = arith.constant 7 : i32
    %86 = arith.index_cast %c7_i32 : i32 to index
    %c0_34 = arith.constant 0 : index
    %c0_35 = arith.constant 0 : index
    %87 = vector.load %arg11[%86, %c0_34, %c0_35] : memref<8x32x32xf32, #tpu.memory_space<vmem>>, vector<1x32x32xf32>
    %88 = vector.shape_cast %87 : vector<1x32x32xf32> to vector<32x32xf32>
    %89 = arith.truncf %85 : vector<32x32xf32> to vector<32x32xbf16>
    %cst_36 = arith.constant dense<0.000000e+00> : vector<32x32xf32>
    %90 = tpu.matmul %89, %11, %cst_36 {dimension_numbers = #tpu.dot_dimension_numbers<[1], [0], [0], [1], [0, 0, 1, 1], [], []>} : vector<32x32xbf16>, vector<32x32xbf16>, vector<32x32xf32> -> vector<32x32xf32>
    %91 = arith.addf %88, %90 : vector<32x32xf32>
    %92 = math.tanh %91 : vector<32x32xf32>
    %93 = vector.broadcast %c7_i32 : i32 to vector<32x32xi32>
    %94 = arith.cmpi slt, %93, %14 : vector<32x32xi32>
    %95 = arith.select %94, %92, %85 : vector<32x32xi1>, vector<32x32xf32>
    %c8_i32 = arith.constant 8 : i32
    %96 = arith.truncf %95 : vector<32x32xf32> to vector<32x32xbf16>
    %c0_37 = arith.constant 0 : index
    %c0_38 = arith.constant 0 : index
    %97 = vector.load %arg7[%c0_37, %c0_38] : memref<32x32xbf16, #tpu.memory_space<vmem>>, vector<32x32xbf16>
    %cst_39 = arith.constant dense<0.000000e+00> : vector<32x32xf32>
    %98 = tpu.matmul %96, %97, %cst_39 {dimension_numbers = #tpu.dot_dimension_numbers<[1], [0], [0], [1], [0, 0, 1, 1], [], []>} : vector<32x32xbf16>, vector<32x32xbf16>, vector<32x32xf32> -> vector<32x32xf32>
    %c0_40 = arith.constant 0 : index
    %c0_41 = arith.constant 0 : index
    %99 = vector.load %arg9[%c0_40, %c0_41] : memref<1x32xf32, #tpu.memory_space<vmem>>, vector<1x32xf32>
    %100 = vector.broadcast %99 : vector<1x32xf32> to vector<32x32xf32>
    %101 = arith.addf %98, %100 : vector<32x32xf32>
    %c0_42 = arith.constant 0 : index
    %c0_43 = arith.constant 0 : index
    %102 = vector.load %arg12[%c0_42, %c0_43] : memref<32x32xf32, #tpu.memory_space<vmem>>, vector<32x32xf32>
    tpu.vector_store %arg12[%c0_42, %c0_43], %101 {strides = array<i32>} : memref<32x32xf32, #tpu.memory_space<vmem>>, vector<32x32xf32>,
    %c0_44 = arith.constant 0 : index
    %c0_45 = arith.constant 0 : index
    %103 = vector.load %arg8[%c0_44, %c0_45] : memref<32x32xbf16, #tpu.memory_space<vmem>>, vector<32x32xbf16>
    %c0_46 = arith.constant 0 : index
    %c0_47 = arith.constant 0 : index
    %104 = vector.load %arg3[%c0_46, %c0_47] : memref<8x1xi32, #tpu.memory_space<vmem>>, vector<8x1xi32>
    %105 = vector.shape_cast %104 : vector<8x1xi32> to vector<8x1xi32>
    %106 = vector.broadcast %105 : vector<8x1xi32> to vector<8x32xi32>
    %cst_48 = arith.constant 0.000000e+00 : f32
    %107 = vector.broadcast %cst_48 : f32 to vector<8x32xf32>
    %c0_i32_49 = arith.constant 0 : i32
    %c8_i32_50 = arith.constant 8 : i32
    %108 = arith.muli %c0_i32_49, %c8_i32_50 : i32
    %109 = tpu.assume_multiple %108, 8 : i32
    %110 = arith.index_cast %109 : i32 to index
    %c0_51 = arith.constant 0 : index
    %111 = vector.load %arg12[%110, %c0_51] : memref<32x32xf32, #tpu.memory_space<vmem>>, vector<8x32xf32>
    %112 = arith.truncf %107 : vector<8x32xf32> to vector<8x32xbf16>
    %cst_52 = arith.constant dense<0.000000e+00> : vector<8x32xf32>
    %113 = tpu.matmul %112, %103, %cst_52 {dimension_numbers = #tpu.dot_dimension_numbers<[1], [0], [0], [1], [0, 0, 1, 1], [], []>} : vector<8x32xbf16>, vector<32x32xbf16>, vector<8x32xf32> -> vector<8x32xf32>
    %114 = arith.addf %111, %113 : vector<8x32xf32>
    %115 = math.tanh %114 : vector<8x32xf32>
    %116 = vector.broadcast %c0_i32_49 : i32 to vector<8x32xi32>
    %117 = arith.cmpi slt, %116, %106 : vector<8x32xi32>
    %118 = arith.select %117, %115, %107 : vector<8x32xi1>, vector<8x32xf32>
    %c1_i32_53 = arith.constant 1 : i32
    %c8_i32_54 = arith.constant 8 : i32
    %119 = arith.muli %c1_i32_53, %c8_i32_54 : i32
    %120 = tpu.assume_multiple %119, 8 : i32
    %121 = arith.index_cast %120 : i32 to index
    %c0_55 = arith.constant 0 : index
    %122 = vector.load %arg12[%121, %c0_55] : memref<32x32xf32, #tpu.memory_space<vmem>>, vector<8x32xf32>
    %123 = arith.truncf %118 : vector<8x32xf32> to vector<8x32xbf16>
    %cst_56 = arith.constant dense<0.000000e+00> : vector<8x32xf32>
    %124 = tpu.matmul %123, %103, %cst_56 {dimension_numbers = #tpu.dot_dimension_numbers<[1], [0], [0], [1], [0, 0, 1, 1], [], []>} : vector<8x32xbf16>, vector<32x32xbf16>, vector<8x32xf32> -> vector<8x32xf32>
    %125 = arith.addf %122, %124 : vector<8x32xf32>
    %126 = math.tanh %125 : vector<8x32xf32>
    %127 = vector.broadcast %c1_i32_53 : i32 to vector<8x32xi32>
    %128 = arith.cmpi slt, %127, %106 : vector<8x32xi32>
    %129 = arith.select %128, %126, %118 : vector<8x32xi1>, vector<8x32xf32>
    %c2_i32_57 = arith.constant 2 : i32
    %c8_i32_58 = arith.constant 8 : i32
    %130 = arith.muli %c2_i32_57, %c8_i32_58 : i32
    %131 = tpu.assume_multiple %130, 8 : i32
    %132 = arith.index_cast %131 : i32 to index
    %c0_59 = arith.constant 0 : index
    %133 = vector.load %arg12[%132, %c0_59] : memref<32x32xf32, #tpu.memory_space<vmem>>, vector<8x32xf32>
    %134 = arith.truncf %129 : vector<8x32xf32> to vector<8x32xbf16>
    %cst_60 = arith.constant dense<0.000000e+00> : vector<8x32xf32>
    %135 = tpu.matmul %134, %103, %cst_60 {dimension_numbers = #tpu.dot_dimension_numbers<[1], [0], [0], [1], [0, 0, 1, 1], [], []>} : vector<8x32xbf16>, vector<32x32xbf16>, vector<8x32xf32> -> vector<8x32xf32>
    %136 = arith.addf %133, %135 : vector<8x32xf32>
    %137 = math.tanh %136 : vector<8x32xf32>
    %138 = vector.broadcast %c2_i32_57 : i32 to vector<8x32xi32>
    %139 = arith.cmpi slt, %138, %106 : vector<8x32xi32>
    %140 = arith.select %139, %137, %129 : vector<8x32xi1>, vector<8x32xf32>
    %c3_i32_61 = arith.constant 3 : i32
    %c8_i32_62 = arith.constant 8 : i32
    %141 = arith.muli %c3_i32_61, %c8_i32_62 : i32
    %142 = tpu.assume_multiple %141, 8 : i32
    %143 = arith.index_cast %142 : i32 to index
    %c0_63 = arith.constant 0 : index
    %144 = vector.load %arg12[%143, %c0_63] : memref<32x32xf32, #tpu.memory_space<vmem>>, vector<8x32xf32>
    %145 = arith.truncf %140 : vector<8x32xf32> to vector<8x32xbf16>
    %cst_64 = arith.constant dense<0.000000e+00> : vector<8x32xf32>
    %146 = tpu.matmul %145, %103, %cst_64 {dimension_numbers = #tpu.dot_dimension_numbers<[1], [0], [0], [1], [0, 0, 1, 1], [], []>} : vector<8x32xbf16>, vector<32x32xbf16>, vector<8x32xf32> -> vector<8x32xf32>
    %147 = arith.addf %144, %146 : vector<8x32xf32>
    %148 = math.tanh %147 : vector<8x32xf32>
    %149 = vector.broadcast %c3_i32_61 : i32 to vector<8x32xi32>
    %150 = arith.cmpi slt, %149, %106 : vector<8x32xi32>
    %151 = arith.select %150, %148, %140 : vector<8x32xi1>, vector<8x32xf32>
    %c4_i32_65 = arith.constant 4 : i32
    %c0_66 = arith.constant 0 : index
    %c0_67 = arith.constant 0 : index
    %152 = vector.load %arg10[%c0_66, %c0_67] : memref<8x32xf32, #tpu.memory_space<vmem>>, vector<8x32xf32>
    tpu.vector_store %arg10[%c0_66, %c0_67], %151 {strides = array<i32>} : memref<8x32xf32, #tpu.memory_space<vmem>>, vector<8x32xf32>,
    return
  }
  func.func @transform_0(%arg0: i32) -> (i32, i32, i32) {
    %c0_i32 = arith.constant 0 : i32
    %c0_i32_0 = arith.constant 0 : i32
    %c0_i32_1 = arith.constant 0 : i32
    return %c0_i32, %arg0, %c0_i32_0 : i32, i32, i32
  }
  func.func @transform_1(%arg0: i32) -> (i32, i32) {
    %c0_i32 = arith.constant 0 : i32
    %c0_i32_0 = arith.constant 0 : i32
    return %arg0, %c0_i32 : i32, i32
  }
  func.func @transform_2(%arg0: i32) -> (i32, i32) {
    %c0_i32 = arith.constant 0 : i32
    %c0_i32_0 = arith.constant 0 : i32
    return %arg0, %c0_i32 : i32, i32
  }
  func.func @transform_3(%arg0: i32) -> (i32, i32) {
    %c0_i32 = arith.constant 0 : i32
    %c0_i32_0 = arith.constant 0 : i32
    %c0_i32_1 = arith.constant 0 : i32
    return %c0_i32, %c0_i32_0 : i32, i32
  }
  func.func @transform_4(%arg0: i32) -> (i32, i32) {
    %c0_i32 = arith.constant 0 : i32
    %c0_i32_0 = arith.constant 0 : i32
    %c0_i32_1 = arith.constant 0 : i32
    return %c0_i32, %c0_i32_0 : i32, i32
  }
  func.func @transform_5(%arg0: i32) -> (i32, i32) {
    %c0_i32 = arith.constant 0 : i32
    %c0_i32_0 = arith.constant 0 : i32
    %c0_i32_1 = arith.constant 0 : i32
    return %c0_i32, %c0_i32_0 : i32, i32
  }
  func.func @transform_6(%arg0: i32) -> (i32, i32) {
    %c0_i32 = arith.constant 0 : i32
    %c0_i32_0 = arith.constant 0 : i32
    %c0_i32_1 = arith.constant 0 : i32
    return %c0_i32, %c0_i32_0 : i32, i32
  }
  func.func @transform_7(%arg0: i32) -> (i32, i32) {
    %c0_i32 = arith.constant 0 : i32
    %c0_i32_0 = arith.constant 0 : i32
    %c0_i32_1 = arith.constant 0 : i32
    return %c0_i32, %c0_i32_0 : i32, i32
  }
  func.func @transform_8(%arg0: i32) -> (i32, i32) {
    %c0_i32 = arith.constant 0 : i32
    %c0_i32_0 = arith.constant 0 : i32
    %c0_i32_1 = arith.constant 0 : i32
    return %c0_i32, %c0_i32_0 : i32, i32
  }
  func.func @transform_9(%arg0: i32) -> (i32, i32) {
    %c0_i32 = arith.constant 0 : i32
    %c0_i32_0 = arith.constant 0 : i32
    return %arg0, %c0_i32 : i32, i32
  }
}

</mosaic_0001>

<bundles_post_ra>
// kernel: tpu_custom_call.1
= control target key start
LH: loop header
LB: loop body
LE: loop exit
PB: predicated region body
PF: predicated region fallthrough
CT: control target
= control target key end

     0   :  { %v1071_v3 = vmov 0   ;;  %s1450_s0 = inlined_call_operand.vmem [shape: f32[8,32,1], index: 0, kind: input, shape index: {}]   ;;  %s1451_s1 = inlined_call_operand.vmem [shape: s32[32,1], index: 1, kind: input, shape index: {}]   ;;  %s1452_s2 = inlined_call_operand.vmem [shape: s32[8,1], index: 2, kind: input, shape index: {}]   ;;  %s1453_s3 = inlined_call_operand.vmem [shape: f32[1,32], index: 3, kind: input, shape index: {}]   ;;  %s1454_s4 = inlined_call_operand.vmem [shape: f32[1,32], index: 4, kind: input, shape index: {}]   ;;  %s1455_s5 = inlined_call_operand.vmem [shape: bf16[32,32], index: 5, kind: input, shape index: {}]   ;;  %s1456_s6 = inlined_call_operand.vmem [shape: bf16[32,32], index: 6, kind: input, shape index: {}]   ;;  %s1457_s7 = inlined_call_operand.vmem [shape: bf16[32,32], index: 7, kind: input, shape index: {}]   ;;  %s1458_s8 = inlined_call_operand.vmem [shape: f32[1,32], index: 8, kind: input, shape index: {}]   ;;  %s1459_s9 = inlined_call_operand.hbm [shape: f32[8,32], index: 9, kind: output, shape index: {}]  }
   0x1   :  { %v335_v0 = vld [vmem:[%s1451_s1] sm:$0xff]  ;;  %v960_v2 = vld [vmem:[%s1455_s5 + $0x8] sm:$0xff]  ;;  %968 = vset.pattern.permute.xlu1 %v1071_v3  ;;  %967 = vset.pattern.permute.xlu0 %v1071_v3 }
   0x2   :  { %v34_v1 = vld [vmem:[%s1450_s0] sm:$0xff]  ;;  %340 = vperm.xlu1 %968, %v335_v0   ;;  %376 = vmatpush.bf16.msra.mxu0 %v960_v2 }
   0x3   :  { %69 = vperm.xlu0 %967, %v34_v1   ;;  %v959_v4 = vld [vmem:[%s1455_s5] sm:$0xff]  ;;  %969 = vset.pattern.permute.xlu2 %v1071_v3 }
   0x4   :  { %424 = vmatpush.bf16.msra.mxu1 %v960_v2  ;;  %472 = vmatpush.bf16.msra.mxu2 %v960_v2 }
   0x5   :  { %520 = vmatpush.bf16.msra.mxu3 %v960_v2 }
   0x6   :  { %14 = vsyncpa [#allocation5], 0  ;;  %377 = vmatpush.bf16.msra.mxu0 %v959_v4  ;;  %v336_v5 = vld [vmem:[%s1451_s1 + $0x8] sm:$0xff]  ;;  %v37_v7 = vld [vmem:[%s1450_s0 + $0x18] sm:$0xff]  ;;  %vm298_vm0 = vcmask 261120  }
   0x7   :  { %v35_v6 = vld [vmem:[%s1450_s0 + $0x8] sm:$0xff]  ;;  %v36_v8 = vld [vmem:[%s1450_s0 + $0x10] sm:$0xff]  ;;  %v38_v9 = vld [vmem:[%s1450_s0 + $0x20] sm:$0xff] }
   0x8   :  { %425 = vmatpush.bf16.msra.mxu1 %v959_v4  ;;  %473 = vmatpush.bf16.msra.mxu2 %v959_v4  ;;  %v337_v10 = vld [vmem:[%s1451_s1 + $0x10] sm:$0xff]  ;;  %v43_v11 = vld [vmem:[%s1450_s0 + $0x48] sm:$0xff]  ;;  %v41_v13 = vld [vmem:[%s1450_s0 + $0x38] sm:$0xff] }
   0x9   :  { %521 = vmatpush.bf16.msra.mxu3 %v959_v4  ;;  %378 = vmatmul.bf16.vlgmr.msra.gmra.mxu0 %v1071_v3  ;;  %v39_v12 = vld [vmem:[%s1450_s0 + $0x28] sm:$0xff]  ;;  %v40_v14 = vld [vmem:[%s1450_s0 + $0x30] sm:$0xff]  ;;  %v42_v15 = vld [vmem:[%s1450_s0 + $0x40] sm:$0xff] }
   0xa   :  { %568 = vmatpush.bf16.msrb.mxu0 %v960_v2  ;;  %343 = vperm.xlu1 %968, %v336_v5   ;;  %v44_v16 = vld [vmem:[%s1450_s0 + $0x50] sm:$0xff]  ;;  %v47_v17 = vld [vmem:[%s1450_s0 + $0x68] sm:$0xff]  ;;  %v338_v18 = vld [vmem:[%s1451_s1 + $0x18] sm:$0xff] }
   0xb   :  { %74 = vperm.xlu0 %967, %v35_v6   ;;  %89 = vperm.xlu2 %969, %v38_v9   ;;  %v51_v19 = vld [vmem:[%s1450_s0 + $0x88] sm:$0xff]  ;;  %v50_v20 = vld [vmem:[%s1450_s0 + $0x80] sm:$0xff]  ;;  %v49_v22 = vld [vmem:[%s1450_s0 + $0x78] sm:$0xff] }
   0xc   :  { %616 = vmatpush.bf16.msrb.mxu1 %v960_v2  ;;  %664 = vmatpush.bf16.msrb.mxu2 %v960_v2  ;;  %v54_v21 = vld [vmem:[%s1450_s0 + $0xa0] sm:$0xff]  ;;  %v53_v23 = vld [vmem:[%s1450_s0 + $0x98] sm:$0xff]  ;;  %v52_v24 = vld [vmem:[%s1450_s0 + $0x90] sm:$0xff] }
   0xd   :  { %712 = vmatpush.bf16.msrb.mxu3 %v960_v2  ;;  %v56_v25 = vld [vmem:[%s1450_s0 + $0xb0] sm:$0xff]  ;;  %v59_v26 = vld [vmem:[%s1450_s0 + $0xc8] sm:$0xff]  ;;  %v62_v28 = vld [vmem:[%s1450_s0 + $0xe0] sm:$0xff] }
   0xe   :  { %569 = vmatpush.bf16.msrb.mxu0 %v959_v4  ;;  %v63_v27 = vld [vmem:[%s1450_s0 + $0xe8] sm:$0xff]  ;;  %v796_v29 = vld [vmem:[%s1452_s2] sm:$0xff]  ;;  %v61_v30 = vld [vmem:[%s1450_s0 + $0xd8] sm:$0xff]  ;;  %s907_s2 = sshll.u32 %s1459_s9, 4  ;;  %s908_s2 = int_to_ptr.hbm [resolvable:$true] %s907_s2 }
   0xf   :  { %v46_v31 = vld [vmem:[%s1450_s0 + $0x60] sm:$0xff]  ;;  %v65_v32 = vld [vmem:[%s1450_s0 + $0xf8] sm:$0xff]  ;;  %v48_v34 = vld [vmem:[%s1450_s0 + $0x70] sm:$0xff] }
  0x10   :  { %617 = vmatpush.bf16.msrb.mxu1 %v959_v4  ;;  %665 = vmatpush.bf16.msrb.mxu2 %v959_v4  ;;  %v45_v33 = vld [vmem:[%s1450_s0 + $0x58] sm:$0xff]  ;;  %v1233_v36 = vld [vmem:[%s1453_s3] ss:$0 sm:$0xff]  ;;  %v55_v39 = vld [vmem:[%s1450_s0 + $0xa8] sm:$0xff] }
  0x11   :  { %713 = vmatpush.bf16.msrb.mxu3 %v959_v4  ;;  %v1238_v37 = vld [vmem:[%s1454_s4] ss:$0 sm:$0xff]  ;;  %v57_v55 = vld [vmem:[%s1450_s0 + $0xb8] sm:$0xff]  ;;  %v60_v1 = vld [vmem:[%s1450_s0 + $0xd0] sm:$0xff] }
  0x12   :  { %84 = vperm.xlu1 %968, %v37_v7   ;;  %v58_v47 = vld [vmem:[%s1450_s0 + $0xc0] sm:$0xff] }
  0x13   :  { %79 = vperm.xlu0 %967, %v36_v8   ;;  %94 = vperm.xlu2 %969, %v39_v12  }
  0x19   :  { %383 = vmatmul.bf16.gmra.mxu0 %v1071_v3 }
  0x1a   :  { %346 = vperm.xlu1 %968, %v337_v10  }
  0x1b   :  { %114 = vperm.xlu0 %967, %v43_v11   ;;  %109 = vperm.xlu2 %969, %v42_v15   ;;  %v64_v11 = vld [vmem:[%s1450_s0 + $0xf0] sm:$0xff] }
  0x22   :  { %104 = vperm.xlu1 %968, %v41_v13  }
  0x23   :  { %99 = vperm.xlu0 %967, %v40_v14   ;;  %349 = vperm.xlu2 %969, %v338_v18  }
  0x2a   :  { %119 = vperm.xlu1 %968, %v44_v16  }
  0x2b   :  { %134 = vperm.xlu0 %967, %v47_v17   ;;  %129 = vperm.xlu2 %969, %v46_v31  }
  0x32   :  { %154 = vperm.xlu1 %968, %v51_v19  }
  0x33   :  { %149 = vperm.xlu0 %967, %v50_v20   ;;  %124 = vperm.xlu2 %969, %v45_v33  }
  0x3a   :  { %169 = vperm.xlu1 %968, %v54_v21  }
  0x3b   :  { %144 = vperm.xlu0 %967, %v49_v22   ;;  %139 = vperm.xlu2 %969, %v48_v34  }
  0x42   :  { %164 = vperm.xlu1 %968, %v53_v23  }
  0x43   :  { %159 = vperm.xlu0 %967, %v52_v24   ;;  %174 = vperm.xlu2 %969, %v55_v39  }
  0x4a   :  { %179 = vperm.xlu1 %968, %v56_v25  }
  0x4b   :  { %194 = vperm.xlu0 %967, %v59_v26   ;;  %189 = vperm.xlu2 %969, %v58_v47  }
  0x52   :  { %214 = vperm.xlu1 %968, %v63_v27  }
  0x53   :  { %209 = vperm.xlu0 %967, %v62_v28   ;;  %184 = vperm.xlu2 %969, %v57_v55  }
  0x5a   :  { %798 = vperm.xlu1 %968, %v796_v29  }
  0x5b   :  { %204 = vperm.xlu0 %967, %v61_v30   ;;  %199 = vperm.xlu2 %969, %v60_v1  }
  0x63   :  { %224 = vperm.xlu0 %967, %v65_v32   ;;  %219 = vperm.xlu2 %969, %v64_v11  }
  0x65   :  { %v90_v35 = vpop.permute.xlu2 %89 }
  0x66   :  { %v234_v38 = vmul.f32 %v1233_v36, %v90_v35 }
  0x68   :  { %v270_v42 = vadd.f32 %v1238_v37, %v234_v38 }
  0x6a   :  { %303 = vst.msk [vmem:[#allocation2 + $0x20] sm:$0xff] %vm298_vm0, %v270_v42 }
  0x6d   :  { %v95_v45 = vpop.permute.xlu2 %94 }
  0x6e   :  { %v235_v46 = vmul.f32 %v1233_v36, %v95_v45 }
  0x70   :  { %v271_v49 = vadd.f32 %v1238_v37, %v235_v46 }
  0x72   :  { %304 = vst.msk [vmem:[#allocation2 + $0x28] sm:$0xff] %vm298_vm0, %v271_v49 }
  0x74   :  { %v1244_v40 = vpop.permute.xlu1 %340 }
  0x75   :  { %v70_v41 = vpop.permute.xlu0 %69  ;;  %v110_v53 = vpop.permute.xlu2 %109  ;;  %vm397_vm1 = vcmp.gt.s32.totalorder %v1244_v40, 0  ;;  %vm445_vm5 = vcmp.gt.s32.totalorder %v1244_v40, 1  ;;  %vm493_vm9 = vcmp.gt.s32.totalorder %v1244_v40, 2  ;;  %vm541_vm13 = vcmp.gt.s32.totalorder %v1244_v40, 3 }
  0x76   :  { %v230_v43 = vmul.f32 %v1233_v36, %v70_v41  ;;  %v238_v54 = vmul.f32 %v1233_v36, %v110_v53 }
  0x78   :  { %v266_v44 = vadd.f32 %v1238_v37, %v230_v43  ;;  %v274_v57 = vadd.f32 %v1238_v37, %v238_v54 }
  0x7a   :  { %299 = vst.msk [vmem:[#allocation2] sm:$0xff] %vm298_vm0, %v266_v44 }
  0x7b   :  { %307 = vst.msk [vmem:[#allocation2 + $0x40] sm:$0xff] %vm298_vm0, %v274_v57 }
  0x7c   :  { %v1255_v48 = vpop.permute.xlu1 %343 }
  0x7d   :  { %v75_v50 = vpop.permute.xlu0 %74  ;;  %vm398_vm2 = vcmp.gt.s32.totalorder %v1255_v48, 0  ;;  %v1306_v35 = vpop.permute.xlu2 %349  ;;  %vm446_vm6 = vcmp.gt.s32.totalorder %v1255_v48, 1  ;;  %vm494_vm10 = vcmp.gt.s32.totalorder %v1255_v48, 2  ;;  %vm542_vm14 = vcmp.gt.s32.totalorder %v1255_v48, 3 }
  0x7e   :  { %v231_v51 = vmul.f32 %v1233_v36, %v75_v50  ;;  %vm400_vm3 = vcmp.gt.s32.totalorder %v1306_v35, 0  ;;  %vm448_vm8 = vcmp.gt.s32.totalorder %v1306_v35, 1  ;;  %vm496_vm12 = vcmp.gt.s32.totalorder %v1306_v35, 2 }
  0x80   :  { %v267_v52 = vadd.f32 %v1238_v37, %v231_v51 }
  0x81   :  { %v351_v0 = vld [vmem:[#allocation2] sm:$0xff] }
  0x82   :  { %300 = vst.msk [vmem:[#allocation2 + $0x8] sm:$0xff] %vm298_vm0, %v267_v52 }
  0x84   :  { %v85_v56 = vpop.permute.xlu1 %84 }
  0x85   :  { %v233_v58 = vmul.f32 %v1233_v36, %v85_v56  ;;  %v80_v59 = vpop.permute.xlu0 %79 }
  0x86   :  { %v232_v60 = vmul.f32 %v1233_v36, %v80_v59  ;;  %v379_v62 = vpop.f32.mrf.mxu0 }
  0x87   :  { %v269_v61 = vadd.f32 %v1238_v37, %v233_v58  ;;  %v389_v2 = vadd.f32 %v379_v62, %v351_v0 }
  0x88   :  { %v268_v63 = vadd.f32 %v1238_v37, %v232_v60  ;;  %v130_v60 = vpop.permute.xlu2 %129 }
  0x89   :  { %302 = vst.msk [vmem:[#allocation2 + $0x18] sm:$0xff] %vm298_vm0, %v269_v61  ;;  %v352_v7 = vld [vmem:[#allocation2 + $0x8] sm:$0xff]  ;;  %973 = vtanh.f32 %v389_v2  ;;  %v242_v0 = vmul.f32 %v1233_v36, %v130_v60 }
  0x8a   :  { %301 = vst.msk [vmem:[#allocation2 + $0x10] sm:$0xff] %vm298_vm0, %v268_v63 }
  0x8b   :  { %v278_v2 = vadd.f32 %v1238_v37, %v242_v0 }
  0x8c   :  { %v1277_v4 = vpop.permute.xlu1 %346 }
  0x8d   :  { %v115_v5 = vpop.permute.xlu0 %114  ;;  %vm399_vm4 = vcmp.gt.s32.totalorder %v1277_v4, 0  ;;  %311 = vst.msk [vmem:[#allocation2 + $0x60] sm:$0xff] %vm298_vm0, %v278_v2  ;;  %vm447_vm7 = vcmp.gt.s32.totalorder %v1277_v4, 1  ;;  %vm495_vm11 = vcmp.gt.s32.totalorder %v1277_v4, 2  ;;  %vm543_vm15 = vcmp.gt.s32.totalorder %v1277_v4, 3 }
  0x8e   :  { %v239_v6 = vmul.f32 %v1233_v36, %v115_v5  ;;  %v381_v8 = vpop.f32.mrf.mxu0 }
  0x8f   :  { %v390_v10 = vadd.f32 %v381_v8, %v352_v7  ;;  %v974_v15 = vpop.eup %973 }
  0x90   :  { %v275_v9 = vadd.f32 %v1238_v37, %v239_v6  ;;  %v1292_v21 = vsel %vm397_vm1, %v974_v15, 0.0  ;;  %v354_v31 = vld [vmem:[#allocation2 + $0x18] sm:$0xff]  ;;  %v125_v7 = vpop.permute.xlu2 %124  ;;  %vm544_vm1 = vcmp.gt.s32.totalorder %v1306_v35, 3 }
  0x91   :  { %975 = vtanh.f32 %v390_v10  ;;  %v353_v24 = vld [vmem:[#allocation2 + $0x10] sm:$0xff] }
  0x92   :  { %308 = vst.msk [vmem:[#allocation2 + $0x48] sm:$0xff] %vm298_vm0, %v275_v9  ;;  %v241_v9 = vmul.f32 %v1233_v36, %v125_v7 }
  0x94   :  { %v105_v12 = vpop.permute.xlu1 %104 }
  0x95   :  { %v237_v13 = vmul.f32 %v1233_v36, %v105_v12  ;;  %v100_v14 = vpop.permute.xlu0 %99  ;;  %v277_v12 = vadd.f32 %v1238_v37, %v241_v9  ;;  %v454_v9 = vld [vmem:[#allocation2 + $0x40] sm:$0xff] }
  0x96   :  { %v236_v16 = vmul.f32 %v1233_v36, %v100_v14  ;;  %v384_v18 = vpop.f32.mrf.mxu0 }
  0x97   :  { %v273_v17 = vadd.f32 %v1238_v37, %v237_v13  ;;  %v976_v19 = vpop.eup %975  ;;  %v391_v25 = vadd.f32 %v384_v18, %v353_v24  ;;  %310 = vst.msk [vmem:[#allocation2 + $0x58] sm:$0xff] %vm298_vm0, %v277_v12 }
  0x98   :  { %v272_v20 = vadd.f32 %v1238_v37, %v236_v16  ;;  %v1294_v22 = vsel %vm398_vm2, %v976_v19, 0.0  ;;  %v140_v16 = vpop.permute.xlu2 %139  ;;  %vm589_vm2 = vcmp.gt.s32.totalorder %v1244_v40, 4 }
  0x99   :  { %306 = vst.msk [vmem:[#allocation2 + $0x38] sm:$0xff] %vm298_vm0, %v273_v17  ;;  %v410_v23 = vpack.c.bf16 %v1294_v22, %v1292_v21  ;;  %977 = vtanh.f32 %v391_v25  ;;  %v244_v18 = vmul.f32 %v1233_v36, %v140_v16 }
  0x9a   :  { %305 = vst.msk [vmem:[#allocation2 + $0x30] sm:$0xff] %vm298_vm0, %v272_v20 }
  0x9b   :  { %924 = vmatmul.msk.bf16.vlgmr.msra.gmra.mxu1 %vm298_vm0, %v410_v23  ;;  %v280_v23 = vadd.f32 %v1238_v37, %v244_v18 }
  0x9c   :  { %v120_v26 = vpop.permute.xlu1 %119 }
  0x9d   :  { %v240_v27 = vmul.f32 %v1233_v36, %v120_v26  ;;  %v135_v28 = vpop.permute.xlu0 %134  ;;  %313 = vst.msk [vmem:[#allocation2 + $0x70] sm:$0xff] %vm298_vm0, %v280_v23 }
  0x9e   :  { %v243_v29 = vmul.f32 %v1233_v36, %v135_v28  ;;  %v386_v32 = vpop.f32.mrf.mxu0 }
  0x9f   :  { %v276_v30 = vadd.f32 %v1238_v37, %v240_v27  ;;  %v392_v34 = vadd.f32 %v386_v32, %v354_v31  ;;  %v978_v42 = vpop.eup %977 }
  0xa0   :  { %v279_v33 = vadd.f32 %v1238_v37, %v243_v29  ;;  %v1315_v47 = vsel %vm399_vm4, %v978_v42, 0.0  ;;  %v175_v25 = vpop.permute.xlu2 %174  ;;  %v409_v0 = vld [vmem:[#allocation2 + $0x38] sm:$0xff]  ;;  %vm591_vm4 = vcmp.gt.s32.totalorder %v1277_v4, 4 }
  0xa1   :  { %309 = vst.msk [vmem:[#allocation2 + $0x50] sm:$0xff] %vm298_vm0, %v276_v30  ;;  %979 = vtanh.f32 %v392_v34  ;;  %v251_v27 = vmul.f32 %v1233_v36, %v175_v25 }
  0xa2   :  { %312 = vst.msk [vmem:[#allocation2 + $0x68] sm:$0xff] %vm298_vm0, %v279_v33 }
  0xa3   :  { %v287_v29 = vadd.f32 %v1238_v37, %v251_v27 }
  0xa4   :  { %v155_v38 = vpop.permute.xlu1 %154 }
  0xa5   :  { %v247_v39 = vmul.f32 %v1233_v36, %v155_v38  ;;  %v150_v41 = vpop.permute.xlu0 %149  ;;  %320 = vst.msk [vmem:[#allocation2 + $0xa8] sm:$0xff] %vm298_vm0, %v287_v29 }
  0xa6   :  { %v246_v43 = vmul.f32 %v1233_v36, %v150_v41 }
  0xa7   :  { %v283_v44 = vadd.f32 %v1238_v37, %v247_v39  ;;  %v980_v45 = vpop.eup %979 }
  0xa8   :  { %v282_v46 = vadd.f32 %v1238_v37, %v246_v43  ;;  %v1317_v49 = vsel %vm400_vm3, %v980_v45, 0.0  ;;  %v190_v31 = vpop.permute.xlu2 %189  ;;  %v456_v18 = vld [vmem:[#allocation2 + $0x50] sm:$0xff]  ;;  %vm590_vm3 = vcmp.gt.s32.totalorder %v1255_v48, 4 }
  0xa9   :  { %316 = vst.msk [vmem:[#allocation2 + $0x88] sm:$0xff] %vm298_vm0, %v283_v44  ;;  %v411_v50 = vpack.c.bf16 %v1317_v49, %v1315_v47  ;;  %v254_v33 = vmul.f32 %v1233_v36, %v190_v31  ;;  %v502_v31 = vld [vmem:[#allocation2 + $0x60] sm:$0xff] }
  0xaa   :  { %315 = vst.msk [vmem:[#allocation2 + $0x80] sm:$0xff] %vm298_vm0, %v282_v46 }
  0xab   :  { %925 = vmatmul.msk.bf16.gmra.mxu1 %vm298_vm0, %v411_v50  ;;  %v290_v38 = vadd.f32 %v1238_v37, %v254_v33  ;;  %v503_v33 = vld [vmem:[#allocation2 + $0x68] sm:$0xff] }
  0xac   :  { %v170_v51 = vpop.permute.xlu1 %169 }
  0xad   :  { %v250_v52 = vmul.f32 %v1233_v36, %v170_v51  ;;  %v145_v53 = vpop.permute.xlu0 %144  ;;  %323 = vst.msk [vmem:[#allocation2 + $0xc0] sm:$0xff] %vm298_vm0, %v290_v38 }
  0xae   :  { %v245_v54 = vmul.f32 %v1233_v36, %v145_v53  ;;  %v406_v53 = vld [vmem:[#allocation2 + $0x20] sm:$0xff] }
  0xaf   :  { %v286_v55 = vadd.f32 %v1238_v37, %v250_v52 }
  0xb0   :  { %v281_v56 = vadd.f32 %v1238_v37, %v245_v54  ;;  %v185_v39 = vpop.permute.xlu2 %184 }
  0xb1   :  { %319 = vst.msk [vmem:[#allocation2 + $0xa0] sm:$0xff] %vm298_vm0, %v286_v55  ;;  %v253_v41 = vmul.f32 %v1233_v36, %v185_v39  ;;  %v407_v55 = vld [vmem:[#allocation2 + $0x28] sm:$0xff] }
  0xb2   :  { %314 = vst.msk [vmem:[#allocation2 + $0x78] sm:$0xff] %vm298_vm0, %v281_v56 }
  0xb3   :  { %v289_v42 = vadd.f32 %v1238_v37, %v253_v41 }
  0xb4   :  { %v165_v57 = vpop.permute.xlu1 %164 }
  0xb5   :  { %v249_v58 = vmul.f32 %v1233_v36, %v165_v57  ;;  %v160_v59 = vpop.permute.xlu0 %159  ;;  %322 = vst.msk [vmem:[#allocation2 + $0xb8] sm:$0xff] %vm298_vm0, %v289_v42 }
  0xb6   :  { %v248_v61 = vmul.f32 %v1233_v36, %v160_v59 }
  0xb7   :  { %v285_v62 = vadd.f32 %v1238_v37, %v249_v58 }
  0xb8   :  { %v284_v63 = vadd.f32 %v1238_v37, %v248_v61  ;;  %v200_v43 = vpop.permute.xlu2 %199 }
  0xb9   :  { %318 = vst.msk [vmem:[#allocation2 + $0x98] sm:$0xff] %vm298_vm0, %v285_v62  ;;  %v256_v44 = vmul.f32 %v1233_v36, %v200_v43  ;;  %v408_v62 = vld [vmem:[#allocation2 + $0x30] sm:$0xff] }
  0xba   :  { %317 = vst.msk [vmem:[#allocation2 + $0x90] sm:$0xff] %vm298_vm0, %v284_v63 }
  0xbb   :  { %v292_v45 = vadd.f32 %v1238_v37, %v256_v44 }
  0xbc   :  { %v180_v1 = vpop.permute.xlu1 %179 }
  0xbd   :  { %v252_v5 = vmul.f32 %v1233_v36, %v180_v1  ;;  %v195_v6 = vpop.permute.xlu0 %194  ;;  %325 = vst.msk [vmem:[#allocation2 + $0xd0] sm:$0xff] %vm298_vm0, %v292_v45 }
  0xbe   :  { %v255_v8 = vmul.f32 %v1233_v36, %v195_v6 }
  0xbf   :  { %v288_v10 = vadd.f32 %v1238_v37, %v252_v5 }
  0xc0   :  { %v291_v11 = vadd.f32 %v1238_v37, %v255_v8  ;;  %v220_v46 = vpop.permute.xlu2 %219 }
  0xc1   :  { %321 = vst.msk [vmem:[#allocation2 + $0xb0] sm:$0xff] %vm298_vm0, %v288_v10  ;;  %v260_v50 = vmul.f32 %v1233_v36, %v220_v46  ;;  %v504_v46 = vld [vmem:[#allocation2 + $0x70] sm:$0xff] }
  0xc2   :  { %324 = vst.msk [vmem:[#allocation2 + $0xc8] sm:$0xff] %vm298_vm0, %v291_v11  ;;  %v455_v11 = vld [vmem:[#allocation2 + $0x48] sm:$0xff] }
  0xc3   :  { %v296_v51 = vadd.f32 %v1238_v37, %v260_v50 }
  0xc4   :  { %v215_v13 = vpop.permute.xlu1 %214 }
  0xc5   :  { %v259_v14 = vmul.f32 %v1233_v36, %v215_v13  ;;  %v210_v15 = vpop.permute.xlu0 %209  ;;  %329 = vst.msk [vmem:[#allocation2 + $0xf0] sm:$0xff] %vm298_vm0, %v296_v51  ;;  %v505_v51 = vld [vmem:[#allocation2 + $0x78] sm:$0xff] }
  0xc6   :  { %v258_v17 = vmul.f32 %v1233_v36, %v210_v15 }
  0xc7   :  { %v295_v19 = vadd.f32 %v1238_v37, %v259_v14 }
  0xc8   :  { %v294_v20 = vadd.f32 %v1238_v37, %v258_v17 }
  0xc9   :  { %328 = vst.msk [vmem:[#allocation2 + $0xe8] sm:$0xff] %vm298_vm0, %v295_v19 }
  0xca   :  { %327 = vst.msk [vmem:[#allocation2 + $0xe0] sm:$0xff] %vm298_vm0, %v294_v20  ;;  %v457_v20 = vld [vmem:[#allocation2 + $0x58] sm:$0xff] }
  0xcd   :  { %v205_v24 = vpop.permute.xlu0 %204 }
  0xce   :  { %v257_v26 = vmul.f32 %v1233_v36, %v205_v24 }
  0xd0   :  { %v293_v28 = vadd.f32 %v1238_v37, %v257_v26 }
  0xd2   :  { %326 = vst.msk [vmem:[#allocation2 + $0xd8] sm:$0xff] %vm298_vm0, %v293_v28 }
  0xd5   :  { %v225_v30 = vpop.permute.xlu0 %224 }
  0xd6   :  { %v261_v32 = vmul.f32 %v1233_v36, %v225_v30 }
  0xd8   :  { %v297_v34 = vadd.f32 %v1238_v37, %v261_v32 }
  0xda   :  { %330 = vst.msk [vmem:[#allocation2 + $0xf8] sm:$0xff] %vm298_vm0, %v297_v34 }
 0x118   :  { %v427_v52 = vpop.f32.mrf.mxu1 }
 0x119   :  { %v437_v54 = vadd.f32 %v427_v52, %v406_v53 }
 0x11b   :  { %981 = vtanh.f32 %v437_v54 }
 0x120   :  { %v429_v56 = vpop.f32.mrf.mxu1 }
 0x121   :  { %v438_v57 = vadd.f32 %v429_v56, %v407_v55  ;;  %v982_v58 = vpop.eup %981 }
 0x122   :  { %v449_v36 = vsel %vm445_vm5, %v982_v58, %v1292_v21  ;;  %vm592_vm5 = vcmp.gt.s32.totalorder %v1306_v35, 4 }
 0x123   :  { %983 = vtanh.f32 %v438_v57 }
 0x128   :  { %v432_v59 = vpop.f32.mrf.mxu1 }
 0x129   :  { %v984_v60 = vpop.eup %983  ;;  %v439_v63 = vadd.f32 %v432_v59, %v408_v62 }
 0x12a   :  { %v450_v37 = vsel %vm446_vm6, %v984_v60, %v1294_v22  ;;  %v550_v60 = vld [vmem:[#allocation2 + $0x80] sm:$0xff]  ;;  %vm637_vm6 = vcmp.gt.s32.totalorder %v1244_v40, 5 }
 0x12b   :  { %v458_v61 = vpack.c.bf16 %v450_v37, %v449_v36  ;;  %985 = vtanh.f32 %v439_v63 }
 0x12d   :  { %926 = vmatmul.msk.bf16.vlgmr.msra.gmra.mxu2 %vm298_vm0, %v458_v61 }
 0x130   :  { %v434_v1 = vpop.f32.mrf.mxu1 }
 0x131   :  { %v440_v2 = vadd.f32 %v434_v1, %v409_v0  ;;  %v986_v5 = vpop.eup %985 }
 0x132   :  { %v451_v21 = vsel %vm447_vm7, %v986_v5, %v1315_v47  ;;  %vm638_vm7 = vcmp.gt.s32.totalorder %v1255_v48, 5 }
 0x133   :  { %987 = vtanh.f32 %v440_v2 }
 0x139   :  { %v988_v6 = vpop.eup %987 }
 0x13a   :  { %v452_v22 = vsel %vm448_vm8, %v988_v6, %v1317_v49  ;;  %vm639_vm8 = vcmp.gt.s32.totalorder %v1277_v4, 5 }
 0x13b   :  { %v459_v7 = vpack.c.bf16 %v452_v22, %v451_v21 }
 0x13d   :  { %927 = vmatmul.msk.bf16.gmra.mxu2 %vm298_vm0, %v459_v7  ;;  %v553_v7 = vld [vmem:[#allocation2 + $0x98] sm:$0xff] }
 0x1b0   :  { %v475_v8 = vpop.f32.mrf.mxu2 }
 0x1b1   :  { %v485_v10 = vadd.f32 %v475_v8, %v454_v9 }
 0x1b3   :  { %989 = vtanh.f32 %v485_v10 }
 0x1b8   :  { %v477_v12 = vpop.f32.mrf.mxu2 }
 0x1b9   :  { %v486_v13 = vadd.f32 %v477_v12, %v455_v11  ;;  %v990_v14 = vpop.eup %989 }
 0x1ba   :  { %v497_v47 = vsel %vm493_vm9, %v990_v14, %v449_v36  ;;  %vm640_vm9 = vcmp.gt.s32.totalorder %v1306_v35, 5 }
 0x1bb   :  { %991 = vtanh.f32 %v486_v13 }
 0x1c0   :  { %v480_v15 = vpop.f32.mrf.mxu2 }
 0x1c1   :  { %v992_v16 = vpop.eup %991  ;;  %v487_v19 = vadd.f32 %v480_v15, %v456_v18 }
 0x1c2   :  { %v498_v49 = vsel %vm494_vm10, %v992_v16, %v450_v37  ;;  %v551_v37 = vld [vmem:[#allocation2 + $0x88] sm:$0xff]  ;;  %v598_v16 = vld [vmem:[#allocation2 + $0xa0] sm:$0xff]  ;;  %vm685_vm10 = vcmp.gt.s32.totalorder %v1244_v40, 6 }
 0x1c3   :  { %v506_v17 = vpack.c.bf16 %v498_v49, %v497_v47  ;;  %993 = vtanh.f32 %v487_v19 }
 0x1c5   :  { %928 = vmatmul.msk.bf16.vlgmr.msra.gmra.mxu3 %vm298_vm0, %v506_v17 }
 0x1c8   :  { %v482_v23 = vpop.f32.mrf.mxu2 }
 0x1c9   :  { %v488_v24 = vadd.f32 %v482_v23, %v457_v20  ;;  %v994_v25 = vpop.eup %993 }
 0x1ca   :  { %v499_v27 = vsel %vm495_vm11, %v994_v25, %v451_v21  ;;  %v552_v21 = vld [vmem:[#allocation2 + $0x90] sm:$0xff]  ;;  %vm686_vm11 = vcmp.gt.s32.totalorder %v1255_v48, 6 }
 0x1cb   :  { %995 = vtanh.f32 %v488_v24 }
 0x1d1   :  { %v996_v26 = vpop.eup %995 }
 0x1d2   :  { %v500_v28 = vsel %vm496_vm12, %v996_v26, %v452_v22  ;;  %vm687_vm12 = vcmp.gt.s32.totalorder %v1277_v4, 6 }
 0x1d3   :  { %v507_v29 = vpack.c.bf16 %v500_v28, %v499_v27 }
 0x1d5   :  { %929 = vmatmul.msk.bf16.gmra.mxu3 %vm298_vm0, %v507_v29  ;;  %v601_v29 = vld [vmem:[#allocation2 + $0xb8] sm:$0xff] }
 0x248   :  { %v523_v30 = vpop.f32.mrf.mxu3 }
 0x249   :  { %v533_v32 = vadd.f32 %v523_v30, %v502_v31 }
 0x24b   :  { %997 = vtanh.f32 %v533_v32 }
 0x250   :  { %v525_v34 = vpop.f32.mrf.mxu3 }
 0x251   :  { %v534_v38 = vadd.f32 %v525_v34, %v503_v33  ;;  %v998_v39 = vpop.eup %997 }
 0x252   :  { %v545_v43 = vsel %vm541_vm13, %v998_v39, %v497_v47  ;;  %vm688_vm13 = vcmp.gt.s32.totalorder %v1306_v35, 6 }
 0x253   :  { %999 = vtanh.f32 %v534_v38 }
 0x258   :  { %v528_v41 = vpop.f32.mrf.mxu3 }
 0x259   :  { %v1000_v42 = vpop.eup %999  ;;  %v535_v50 = vadd.f32 %v528_v41, %v504_v46  ;;  %v647_v46 = vld [vmem:[#allocation2 + $0xc8] sm:$0xff] }
 0x25a   :  { %v546_v44 = vsel %vm542_vm14, %v1000_v42, %v498_v49  ;;  %v599_v49 = vld [vmem:[#allocation2 + $0xa8] sm:$0xff]  ;;  %v646_v42 = vld [vmem:[#allocation2 + $0xc0] sm:$0xff]  ;;  %vm733_vm14 = vcmp.gt.s32.totalorder %v1244_v40, 7 }
 0x25b   :  { %v554_v45 = vpack.c.bf16 %v546_v44, %v545_v43  ;;  %1001 = vtanh.f32 %v535_v50 }
 0x25d   :  { %930 = vmatmul.msk.bf16.vlgmr.msrb.gmra.mxu0 %vm298_vm0, %v554_v45  ;;  %v964_v45 = vld [vmem:[%s1457_s7 + $0x8] sm:$0xff] }
 0x25e   :  { %819 = vmatpush.bf16.msra.mxu1 %v964_v45  ;;  %842 = vmatpush.bf16.msra.mxu2 %v964_v45 }
 0x25f   :  { %865 = vmatpush.bf16.msra.mxu3 %v964_v45 }
 0x260   :  { %v530_v52 = vpop.f32.mrf.mxu3 }
 0x261   :  { %v536_v53 = vadd.f32 %v530_v52, %v505_v51  ;;  %v1002_v54 = vpop.eup %1001 }
 0x262   :  { %v547_v56 = vsel %vm543_vm15, %v1002_v54, %v499_v27  ;;  %v600_v27 = vld [vmem:[#allocation2 + $0xb0] sm:$0xff]  ;;  %vm734_vm15 = vcmp.gt.s32.totalorder %v1255_v48, 7 }
 0x263   :  { %1003 = vtanh.f32 %v536_v53 }
 0x269   :  { %v1004_v55 = vpop.eup %1003 }
 0x26a   :  { %v548_v57 = vsel %vm544_vm1, %v1004_v55, %v500_v28  ;;  %vm735_vm1 = vcmp.gt.s32.totalorder %v1277_v4, 7 }
 0x26b   :  { %v555_v58 = vpack.c.bf16 %v548_v57, %v547_v56 }
 0x26d   :  { %931 = vmatmul.msk.bf16.gmra.mxu0 %vm298_vm0, %v555_v58  ;;  %v648_v58 = vld [vmem:[#allocation2 + $0xd0] sm:$0xff] }
 0x2da   :  { %v571_v59 = vpop.f32.mrf.mxu0 }
 0x2db   :  { %v581_v36 = vadd.f32 %v571_v59, %v550_v60  ;;  %v649_v60 = vld [vmem:[#allocation2 + $0xd8] sm:$0xff] }
 0x2dd   :  { %1005 = vtanh.f32 %v581_v36 }
 0x2e2   :  { %v573_v61 = vpop.f32.mrf.mxu0 }
 0x2e3   :  { %v582_v62 = vadd.f32 %v573_v61, %v551_v37  ;;  %v1006_v63 = vpop.eup %1005 }
 0x2e4   :  { %v593_v2 = vsel %vm589_vm2, %v1006_v63, %v545_v43  ;;  %vm736_vm2 = vcmp.gt.s32.totalorder %v1306_v35, 7  ;;  %v799_v35 = vpop.permute.xlu1 %798 }
 0x2e5   :  { %1007 = vtanh.f32 %v582_v62 }
 0x2ea   :  { %v576_v0 = vpop.f32.mrf.mxu0 }
 0x2eb   :  { %v1008_v1 = vpop.eup %1007  ;;  %v583_v22 = vadd.f32 %v576_v0, %v552_v21  ;;  %v694_v21 = vld [vmem:[#allocation2 + $0xe0] sm:$0xff] }
 0x2ec   :  { %v594_v5 = vsel %vm590_vm3, %v1008_v1, %v546_v44  ;;  %v962_v44 = vld [vmem:[%s1456_s6 + $0x8] sm:$0xff]  ;;  %vm828_vm3 = vcmp.gt.s32.totalorder %v799_v35, 0 }
 0x2ed   :  { %v602_v6 = vpack.c.bf16 %v594_v5, %v593_v2  ;;  %1009 = vtanh.f32 %v583_v22  ;;  %775 = vmatpush.bf16.msra.mxu0 %v962_v44 }
 0x2ef   :  { %932 = vmatmul.msk.bf16.vlgmr.msrb.gmra.mxu1 %vm298_vm0, %v602_v6 }
 0x2f2   :  { %v578_v8 = vpop.f32.mrf.mxu0 }
 0x2f3   :  { %v584_v9 = vadd.f32 %v578_v8, %v553_v7  ;;  %v1010_v10 = vpop.eup %1009  ;;  %v695_v7 = vld [vmem:[#allocation2 + $0xe8] sm:$0xff] }
 0x2f4   :  { %v595_v12 = vsel %vm591_vm4, %v1010_v10, %v547_v56  ;;  %vm851_vm4 = vcmp.gt.s32.totalorder %v799_v35, 1 }
 0x2f5   :  { %1011 = vtanh.f32 %v584_v9 }
 0x2fb   :  { %v1012_v11 = vpop.eup %1011 }
 0x2fc   :  { %v596_v13 = vsel %vm592_vm5, %v1012_v11, %v548_v57  ;;  %vm874_vm5 = vcmp.gt.s32.totalorder %v799_v35, 2 }
 0x2fd   :  { %v603_v14 = vpack.c.bf16 %v596_v13, %v595_v12 }
 0x2ff   :  { %933 = vmatmul.msk.bf16.gmra.mxu1 %vm298_vm0, %v603_v14 }
 0x36c   :  { %v619_v15 = vpop.f32.mrf.mxu1 }
 0x36d   :  { %v629_v47 = vadd.f32 %v619_v15, %v598_v16 }
 0x36f   :  { %1013 = vtanh.f32 %v629_v47  ;;  %v697_v47 = vld [vmem:[#allocation2 + $0xf8] sm:$0xff] }
 0x374   :  { %v621_v17 = vpop.f32.mrf.mxu1 }
 0x375   :  { %v630_v18 = vadd.f32 %v621_v17, %v599_v49  ;;  %v1014_v19 = vpop.eup %1013 }
 0x376   :  { %v641_v24 = vsel %vm637_vm6, %v1014_v19, %v593_v2  ;;  %v961_v2 = vld [vmem:[%s1456_s6] sm:$0xff]  ;;  %vm897_vm6 = vcmp.gt.s32.totalorder %v799_v35, 3 }
 0x377   :  { %1015 = vtanh.f32 %v630_v18  ;;  %776 = vmatpush.bf16.msra.mxu0 %v961_v2 }
 0x37c   :  { %v624_v20 = vpop.f32.mrf.mxu1 }
 0x37d   :  { %v1016_v23 = vpop.eup %1015  ;;  %v631_v28 = vadd.f32 %v624_v20, %v600_v27 }
 0x37e   :  { %v642_v25 = vsel %vm638_vm7, %v1016_v23, %v594_v5  ;;  %v963_v5 = vld [vmem:[%s1457_s7] sm:$0xff] }
 0x37f   :  { %v650_v26 = vpack.c.bf16 %v642_v25, %v641_v24  ;;  %1017 = vtanh.f32 %v631_v28  ;;  %820 = vmatpush.bf16.msra.mxu1 %v963_v5  ;;  %843 = vmatpush.bf16.msra.mxu2 %v963_v5 }
 0x380   :  { %866 = vmatpush.bf16.msra.mxu3 %v963_v5 }
 0x381   :  { %934 = vmatmul.msk.bf16.vlgmr.msrb.gmra.mxu2 %vm298_vm0, %v650_v26 }
 0x382   :  { %821 = vmatmul.bf16.vlgmr.msra.gmra.mxu1 %v1071_v3  ;;  %v696_v3 = vld [vmem:[#allocation2 + $0xf0] sm:$0xff] }
 0x383   :  { %888 = vmatpush.bf16.msrb.mxu1 %v964_v45 }
 0x384   :  { %v626_v30 = vpop.f32.mrf.mxu1 }
 0x385   :  { %v632_v31 = vadd.f32 %v626_v30, %v601_v29  ;;  %v1018_v32 = vpop.eup %1017 }
 0x386   :  { %v643_v34 = vsel %vm639_vm8, %v1018_v32, %v595_v12 }
 0x387   :  { %1019 = vtanh.f32 %v632_v31  ;;  %889 = vmatpush.bf16.msrb.mxu1 %v963_v5 }
 0x38d   :  { %v1020_v33 = vpop.eup %1019 }
 0x38e   :  { %v644_v38 = vsel %vm640_vm9, %v1020_v33, %v596_v13 }
 0x38f   :  { %v651_v39 = vpack.c.bf16 %v644_v38, %v643_v34 }
 0x391   :  { %935 = vmatmul.msk.bf16.gmra.mxu2 %vm298_vm0, %v651_v39 }
 0x3ff   :  { %v822_v23 = vpop.f32.mrf.mxu1 }
 0x404   :  { %v667_v41 = vpop.f32.mrf.mxu2 }
 0x405   :  { %v677_v43 = vadd.f32 %v667_v41, %v646_v42 }
 0x407   :  { %1021 = vtanh.f32 %v677_v43 }
 0x40c   :  { %v669_v50 = vpop.f32.mrf.mxu2 }
 0x40d   :  { %v678_v51 = vadd.f32 %v669_v50, %v647_v46  ;;  %v1022_v52 = vpop.eup %1021 }
 0x40e   :  { %v689_v55 = vsel %vm685_vm10, %v1022_v52, %v641_v24  ;;  %v824_v24 = vpop.f32.mrf.mxu1 }
 0x40f   :  { %1023 = vtanh.f32 %v678_v51 }
 0x414   :  { %v672_v53 = vpop.f32.mrf.mxu2 }
 0x415   :  { %v1024_v54 = vpop.eup %1023  ;;  %v679_v59 = vadd.f32 %v672_v53, %v648_v58 }
 0x416   :  { %v690_v56 = vsel %vm686_vm11, %v1024_v54, %v642_v25  ;;  %v972_v25 = vld [vmem:[%s1458_s8] ss:$0 sm:$0xff]  ;;  %s1072_s8 = smov [#allocation4]  }
 0x417   :  { %v698_v57 = vpack.c.bf16 %v690_v56, %v689_v55  ;;  %1025 = vtanh.f32 %v679_v59  ;;  %s905_s26 = sshll.u32 %s1072_s8, 4  ;;  %s906_s26 = int_to_ptr.vmem [resolvable:$true] %s905_s26 }
 0x419   :  { %936 = vmatmul.msk.bf16.vlgmr.msrb.gmra.mxu3 %vm298_vm0, %v698_v57 }
 0x41c   :  { %v674_v36 = vpop.f32.mrf.mxu2 }
 0x41d   :  { %v680_v37 = vadd.f32 %v674_v36, %v649_v60  ;;  %v1026_v61 = vpop.eup %1025 }
 0x41e   :  { %v691_v63 = vsel %vm687_vm12, %v1026_v61, %v643_v34 }
 0x41f   :  { %1027 = vtanh.f32 %v680_v37 }
 0x425   :  { %v1028_v62 = vpop.eup %1027 }
 0x426   :  { %v692_v0 = vsel %vm688_vm13, %v1028_v62, %v644_v38 }
 0x427   :  { %v699_v1 = vpack.c.bf16 %v692_v0, %v691_v63 }
 0x429   :  { %937 = vmatmul.msk.bf16.gmra.mxu3 %vm298_vm0, %v699_v1 }
 0x49c   :  { %v715_v6 = vpop.f32.mrf.mxu3 }
 0x49d   :  { %v725_v22 = vadd.f32 %v715_v6, %v694_v21 }
 0x49f   :  { %1029 = vtanh.f32 %v725_v22 }
 0x4a4   :  { %v717_v8 = vpop.f32.mrf.mxu3 }
 0x4a5   :  { %v726_v9 = vadd.f32 %v717_v8, %v695_v7  ;;  %v1030_v10 = vpop.eup %1029 }
 0x4a6   :  { %v737_v13 = vsel %vm733_vm14, %v1030_v10, %v689_v55 }
 0x4a7   :  { %1031 = vtanh.f32 %v726_v9 }
 0x4ac   :  { %v720_v11 = vpop.f32.mrf.mxu3 }
 0x4ad   :  { %v1032_v12 = vpop.eup %1031  ;;  %v727_v16 = vadd.f32 %v720_v11, %v696_v3 }
 0x4ae   :  { %v738_v14 = vsel %vm734_vm15, %v1032_v12, %v690_v56 }
 0x4af   :  { %v741_v15 = vpack.c.bf16 %v738_v14, %v737_v13  ;;  %1033 = vtanh.f32 %v727_v16 }
 0x4b1   :  { %946 = vmatmul.msk.bf16.vlgmr.msra.gmra.mxu0 %vm298_vm0, %v741_v15 }
 0x4b4   :  { %v722_v49 = vpop.f32.mrf.mxu3 }
 0x4b5   :  { %v728_v17 = vadd.f32 %v722_v49, %v697_v47  ;;  %v1034_v18 = vpop.eup %1033 }
 0x4b6   :  { %v739_v40 = vsel %vm735_vm1, %v1034_v18, %v691_v63 }
 0x4b7   :  { %1035 = vtanh.f32 %v728_v17 }
 0x4bd   :  { %v1036_v19 = vpop.eup %1035 }
 0x4be   :  { %v740_v48 = vsel %vm736_vm2, %v1036_v19, %v692_v0 }
 0x4bf   :  { %v742_v20 = vpack.c.bf16 %v740_v48, %v739_v40 }
 0x4c1   :  { %947 = vmatmul.msk.bf16.gmra.mxu0 %vm298_vm0, %v742_v20 }
 0x52e   :  { %v778_v26 = vpop.f32.mrf.mxu0 }
 0x52f   :  { %v779_v27 = vadd.f32 %v972_v25, %v778_v26 }
 0x531   :  { %788 = vst.msk [vmem:[#allocation3] sm:$0xff] %vm298_vm0, %v779_v27 }
 0x536   :  { %v780_v28 = vpop.f32.mrf.mxu0 }
 0x537   :  { %v781_v29 = vadd.f32 %v972_v25, %v780_v28 }
 0x538   :  { %v800_v4 = vld [vmem:[#allocation3] sm:$0xff] }
 0x539   :  { %v826_v30 = vadd.f32 %v822_v23, %v800_v4  ;;  %789 = vst.msk [vmem:[#allocation3 + $0x8] sm:$0xff] %vm298_vm0, %v781_v29 }
 0x53b   :  { %1037 = vtanh.f32 %v826_v30 }
 0x53e   :  { %v783_v31 = vpop.f32.mrf.mxu0 }
 0x53f   :  { %v784_v32 = vadd.f32 %v972_v25, %v783_v31 }
 0x540   :  { %v831_v42 = vld [vmem:[#allocation3 + $0x8] sm:$0xff] }
 0x541   :  { %v1038_v33 = vpop.eup %1037  ;;  %790 = vst.msk [vmem:[#allocation3 + $0x10] sm:$0xff] %vm298_vm0, %v784_v32 }
 0x542   :  { %v829_v34 = vsel %vm828_vm3, %v1038_v33, 0.0 }
 0x543   :  { %v832_v38 = vpack.c.bf16 %v829_v34, %v829_v34 }
 0x545   :  { %956 = vmatmul.msk.bf16.vlgmr.msra.gmra.mxu2 %vm298_vm0, %v832_v38 }
 0x546   :  { %v785_v39 = vpop.f32.mrf.mxu0 }
 0x547   :  { %v786_v41 = vadd.f32 %v972_v25, %v785_v39 }
 0x548   :  { %v854_v52 = vld [vmem:[#allocation3 + $0x10] sm:$0xff] }
 0x549   :  { %791 = vst.msk [vmem:[#allocation3 + $0x18] sm:$0xff] %vm298_vm0, %v786_v41 }
 0x550   :  { %v877_v59 = vld [vmem:[#allocation3 + $0x18] sm:$0xff] }
 0x5c8   :  { %v845_v43 = vpop.f32.mrf.mxu2 }
 0x5c9   :  { %v849_v44 = vadd.f32 %v845_v43, %v831_v42 }
 0x5cb   :  { %1039 = vtanh.f32 %v849_v44 }
 0x5d0   :  { %v847_v45 = vpop.f32.mrf.mxu2 }
 0x5d1   :  { %v1040_v46 = vpop.eup %1039 }
 0x5d2   :  { %v852_v50 = vsel %vm851_vm4, %v1040_v46, %v829_v34 }
 0x5d3   :  { %v855_v51 = vpack.c.bf16 %v852_v50, %v852_v50 }
 0x5d5   :  { %957 = vmatmul.msk.bf16.vlgmr.msra.gmra.mxu3 %vm298_vm0, %v855_v51 }
 0x658   :  { %v868_v53 = vpop.f32.mrf.mxu3 }
 0x659   :  { %v872_v54 = vadd.f32 %v868_v53, %v854_v52 }
 0x65b   :  { %1041 = vtanh.f32 %v872_v54 }
 0x660   :  { %v870_v55 = vpop.f32.mrf.mxu3 }
 0x661   :  { %v1042_v56 = vpop.eup %1041 }
 0x662   :  { %v875_v57 = vsel %vm874_vm5, %v1042_v56, %v852_v50 }
 0x663   :  { %v878_v58 = vpack.c.bf16 %v875_v57, %v875_v57 }
 0x665   :  { %958 = vmatmul.msk.bf16.vlgmr.msrb.gmra.mxu1 %vm298_vm0, %v878_v58 }
 0x6e2   :  { %v891_v60 = vpop.f32.mrf.mxu1 }
 0x6e3   :  { %v895_v36 = vadd.f32 %v891_v60, %v877_v59 }
 0x6e5   :  { %1043 = vtanh.f32 %v895_v36 }
 0x6ea   :  { %v893_v37 = vpop.f32.mrf.mxu1 }
 0x6eb   :  { %v1044_v61 = vpop.eup %1043 }
 0x6ec   :  { %v898_v62 = vsel %vm897_vm6, %v1044_v61, %v875_v57 }
 0x6ed   :  { %899 = vst.msk [vmem:[#allocation4] sm:$0xff] %vm298_vm0, %v898_v62 }
 0x6ee   :  { %910 = dma.vmem_to_hbm [thread:$0]  %s906_s26, 128, %s908_s2, [#allocation5]  }
 0x6ef   :  { %1069 = dma.done.wait [#allocation5], 128  }
 0x6f0   :  { %1070 = vsyncadd [#allocation5], 4294967168 }
 0x6f1   :  { %915 = vsyncpa [#allocation5], 1 }

</bundles_post_ra>
